<compile_context>
chip_gen: v7x
topology: tpu7x:2x2x1
jax: 0.10.0
libtpu: 0.0.40
codegen_flags: <defaults>
</compile_context>

<pallas_src>
import jax
import jax.numpy as jnp
from jax.experimental import pallas as pl
from jax.experimental.pallas import tpu as pltpu

# ---------------- problem sizes (small, synthetic) ----------------
B = 2          # batch
S = 16         # sequence length
H = 32         # hidden size
V = 256        # vocab size (multiple of 128 -> lane-dense vocab tiles)
N = B * S      # flattened tokens
TN = 16        # token tile (bf16-native sublane tile; divisible by 8/16)
TV = 128       # vocab tile (lane tile)
IGNORE = -100


# ------- fused kernel: embedding row-gather + lm_head + shifted CE loss -------
def fused_lm_kernel(ids_ref,                     # [N]      i32  SMEM (scalar prefetch)
                    tgt_ref,                     # [TN, 1]  i32  VMEM tile (next-token labels)
                    embed_ref,                   # [V, H]   f32  VMEM (resident)
                    w_ref,                       # [H, TV]  bf16 VMEM tile of lm_head
                    logits_ref,                  # [TN, TV] bf16 out tile
                    nll_ref,                     # [TN, 1]  f32  out tile (masked per-token NLL)
                    hid_sc,                      # [TN, H]  f32  scratch
                    m_sc, l_sc, picked_sc):      # [TN, 1]  f32  scratch each
    i = pl.program_id(0)                         # token-tile index ("parallel")
    j = pl.program_id(1)                         # vocab-tile index ("arbitrary", innermost)

    # ---- once per token tile: init accumulators + gather embedding rows ----
    @pl.when(j == 0)
    def _():
        m_sc[...] = jnp.full_like(m_sc, -jnp.inf)
        l_sc[...] = jnp.zeros_like(l_sc)
        picked_sc[...] = jnp.zeros_like(picked_sc)
        base = i * TN
        # O(TN*H) row gather, independent of V (replaces one-hot @ embed).
        # TODO(synk): at real vocab sizes gather straight from HBM with a
        # scalar-prefetch-driven pl.Element index_map / manual DMA instead of
        # keeping the whole table resident in VMEM.
        for r in range(TN):                      # static unroll (TN=16)
            idx = ids_ref[base + r]
            idx = jnp.minimum(jnp.maximum(idx, 0), V - 1)   # clamp OOB ids
            hid_sc[pl.ds(r, 1), :] = embed_ref[pl.ds(idx, 1), :]

    # ---- lm_head tile on the MXU: bf16 operands, f32 accumulation ----
    logits = jnp.dot(hid_sc[...].astype(jnp.bfloat16), w_ref[...],
                     preferred_element_type=jnp.float32)     # [TN, TV] f32
    logits_ref[...] = logits.astype(logits_ref.dtype)        # bf16, lane-dense vst

    # ---- online log-sum-exp + target pick fused over the vocab axis ----
    tgt = tgt_ref[...]                                        # [TN, 1] i32
    col = jax.lax.broadcasted_iota(jnp.int32, (TN, TV), 1) + j * TV

    m_new = jnp.maximum(m_sc[...], jnp.max(logits, axis=-1, keepdims=True))
    alpha = jnp.exp(m_sc[...] - m_new)                        # 0 at first tile
    l_sc[...] = alpha * l_sc[...] + jnp.sum(jnp.exp(logits - m_new),
                                            axis=-1, keepdims=True)
    m_sc[...] = m_new
    # target falls in exactly one vocab tile; select+reduce, no second one-hot
    picked_sc[...] += jnp.sum(jnp.where(col == tgt, logits, 0.0),
                              axis=-1, keepdims=True)

    # ---- finalize after the last vocab tile ----
    @pl.when(j == pl.num_programs(1) - 1)
    def _():
        lse = m_sc[...] + jnp.log(l_sc[...])
        valid = tgt != IGNORE
        nll_ref[...] = jnp.where(valid, lse - picked_sc[...], 0.0)


def lm_head_and_loss(ids_flat, targets_2d, embed, lm_head_bf16):
    grid = (N // TN, V // TV)
    cost = pl.CostEstimate(
        flops=2 * N * H * V,
        transcendentals=N * V + N,
        bytes_accessed=(N * 4                      # ids
                        + N * 4                    # targets
                        + V * H * 4                # embed table
                        + H * V * 2 * (N // TN)    # lm_head tiles streamed per token tile
                        + N * V * 2                # bf16 logits out
                        + N * 4))                  # nll out
    return pl.pallas_call(
        fused_lm_kernel,
        out_shape=(
            jax.ShapeDtypeStruct((N, V), jnp.bfloat16),   # logits (bf16 writeback)
            jax.ShapeDtypeStruct((N, 1), jnp.float32),    # masked per-token NLL
        ),
        grid_spec=pltpu.PrefetchScalarGridSpec(
            num_scalar_prefetch=1,                        # ids -> SMEM
            grid=grid,
            in_specs=[
                pl.BlockSpec((TN, 1), lambda i, j, ids: (i, 0)),   # targets tile
                pl.BlockSpec((V, H), lambda i, j, ids: (0, 0)),    # embed (resident)
                pl.BlockSpec((H, TV), lambda i, j, ids: (0, j)),   # lm_head tile (bf16)
            ],
            out_specs=(
                pl.BlockSpec((TN, TV), lambda i, j, ids: (i, j)),  # logits tile
                pl.BlockSpec((TN, 1), lambda i, j, ids: (i, 0)),   # nll tile (resident over j)
            ),
            scratch_shapes=[
                pltpu.VMEM((TN, H), jnp.float32),   # gathered hidden
                pltpu.VMEM((TN, 1), jnp.float32),   # running max
                pltpu.VMEM((TN, 1), jnp.float32),   # running sum-exp
                pltpu.VMEM((TN, 1), jnp.float32),   # picked target logit
            ],
        ),
        compiler_params=pltpu.CompilerParams(
            dimension_semantics=("parallel", "arbitrary")),
        cost_estimate=cost,
    )(ids_flat, targets_2d, embed, lm_head_bf16)


# ---------------- BaseModel.forward equivalent ----------------
def base_model_forward(params, batch):
    input_ids = batch["teacher_full_input_ids"]            # [B, S] i32
    attention_mask = batch["teacher_full_attention_mask"]  # [B, S] i32
    loss_mask = batch["teacher_full_loss_mask"]            # [B, S] i32

    # labels = input_ids.masked_fill(loss_mask == 0, -100)
    labels = jnp.where(loss_mask == 0, IGNORE, input_ids).astype(jnp.int32)
    # HF causal-LM shift: position t predicts token t+1 (last position ignored).
    targets = jnp.concatenate(
        [labels[:, 1:], jnp.full((B, 1), IGNORE, jnp.int32)], axis=1).reshape(N, 1)
    ids_flat = input_ids.reshape(N).astype(jnp.int32)

    logits_bf16, nll = lm_head_and_loss(
        ids_flat, targets, params["embed"], params["lm_head"])

    # Final masked mean + num_tokens are trivial glue, cheaper left to XLA.
    count = jnp.sum((targets != IGNORE).astype(jnp.float32))
    # NOTE: PyTorch CE returns NaN when *every* label is ignore_index (0/0);
    # the guard makes that corner case 0.0 instead of NaN.
    loss = jnp.sum(nll) / jnp.maximum(count, 1.0)

    return {
        "loss": loss,
        "logits": logits_bf16.reshape(B, S, V),
        "num_tokens": jnp.sum(attention_mask),   # outputs['num_tokens']
    }


if __name__ == "__main__":
    key = jax.random.PRNGKey(0)
    k_embed, k_head, k_ids = jax.random.split(key, 3)

    # deterministic synthetic parameters (lm_head stored in bf16 per perf review)
    params = {
        "embed": jax.random.normal(k_embed, (V, H), jnp.float32) * 0.02,
        "lm_head": (jax.random.normal(k_head, (H, V), jnp.float32) * 0.02
                    ).astype(jnp.bfloat16),
    }

    # deterministic synthetic batch
    input_ids = jax.random.randint(k_ids, (B, S), 0, V, jnp.int32)
    attention_mask = jnp.ones((B, S), jnp.int32)
    # prompt (first 3 tokens) has no loss; rest does
    loss_mask = (jnp.arange(S)[None, :] >= 3).astype(jnp.int32).repeat(B, axis=0)

    batch = {
        "teacher_full_input_ids": input_ids,
        "teacher_full_attention_mask": attention_mask,
        "teacher_full_loss_mask": loss_mask,
    }

    out = base_model_forward(params, batch)
    jax.block_until_ready(out)

    # ---- pure-JAX reference (same bf16-operand / f32-accumulate numerics) ----
    hidden_ref = params["embed"][input_ids.reshape(-1)]                  # [N, H] f32
    logits_ref = jnp.dot(hidden_ref.astype(jnp.bfloat16), params["lm_head"],
                         preferred_element_type=jnp.float32)             # [N, V] f32
    labels_ref = jnp.where(loss_mask == 0, IGNORE, input_ids)
    targets_ref = jnp.concatenate(
        [labels_ref[:, 1:], jnp.full((B, 1), IGNORE, jnp.int32)], axis=1).reshape(-1)
    logp = jax.nn.log_softmax(logits_ref, axis=-1)
    valid = targets_ref != IGNORE
    safe_t = jnp.where(valid, targets_ref, 0)
    nll_ref = -jnp.take_along_axis(logp, safe_t[:, None], axis=-1)[:, 0]
    loss_ref_val = jnp.sum(jnp.where(valid, nll_ref, 0.0)) / jnp.sum(valid)

    assert jnp.allclose(out["loss"], loss_ref_val, rtol=1e-3, atol=1e-3), (
        float(out["loss"]), float(loss_ref_val))
    got_logits = out["logits"].reshape(N, V).astype(jnp.float32)
    ref_logits = logits_ref.astype(jnp.bfloat16).astype(jnp.float32)
    assert jnp.allclose(got_logits, ref_logits, rtol=2e-2, atol=1e-4), (
        float(jnp.max(jnp.abs(got_logits - ref_logits))))
    assert int(out["num_tokens"]) == int(jnp.sum(attention_mask))

    print("KERNEL_OK")
</pallas_src>

<mosaic_0001>
module attributes {stable_mosaic.version = 11 : i64} {
  func.func @fused_lm_kernel(%arg0: i32, %arg1: i32, %arg2: memref<32xi32, #tpu.memory_space<smem>>, %arg3: memref<16x1xi32, #tpu.memory_space<vmem>>, %arg4: memref<256x32xf32, #tpu.memory_space<vmem>>, %arg5: memref<32x128xbf16, #tpu.memory_space<vmem>>, %arg6: memref<16x128xbf16, #tpu.memory_space<vmem>>, %arg7: memref<16x1xf32, #tpu.memory_space<vmem>>, %arg8: memref<16x32xf32, #tpu.memory_space<vmem>>, %arg9: memref<16x1xf32, #tpu.memory_space<vmem>>, %arg10: memref<16x1xf32, #tpu.memory_space<vmem>>, %arg11: memref<16x1xf32, #tpu.memory_space<vmem>>) attributes {dimension_semantics = [#tpu.dimension_semantics<parallel>, #tpu.dimension_semantics<arbitrary>], iteration_bounds = array<i64: 2, 2>, scalar_prefetch = 1 : i64, scratch_operands = 4 : i64, tpu.core_type = #tpu.core_type<tc>, window_params = [{transform_indices = @transform_0, window_bounds = array<i64: 16, 1>}, {pipeline_mode = #tpu.pipeline_mode<synchronous>, transform_indices = @transform_1, window_bounds = array<i64: 256, 32>}, {transform_indices = @transform_2, window_bounds = array<i64: 32, 128>}, {transform_indices = @transform_3, window_bounds = array<i64: 16, 128>}, {transform_indices = @transform_4, window_bounds = array<i64: 16, 1>}]} {
    %c0_i32 = arith.constant 0 : i32
    %0 = arith.cmpi eq, %arg1, %c0_i32 : i32
    %1 = arith.extui %0 : i1 to i32
    %c0_i32_0 = arith.constant 0 : i32
    %2 = arith.cmpi ne, %1, %c0_i32_0 : i32
    scf.if %2 {
      %cst_27 = arith.constant 0xFF800000 : f32
      %43 = vector.broadcast %cst_27 : f32 to vector<16x1xf32>
      %c0_28 = arith.constant 0 : index
      %c0_29 = arith.constant 0 : index
      %44 = vector.load %arg9[%c0_28, %c0_29] : memref<16x1xf32, #tpu.memory_space<vmem>>, vector<16x1xf32>
      tpu.vector_store %arg9[%c0_28, %c0_29], %43 {strides = array<i32>} : memref<16x1xf32, #tpu.memory_space<vmem>>, vector<16x1xf32>,
      %cst_30 = arith.constant 0.000000e+00 : f32
      %45 = vector.broadcast %cst_30 : f32 to vector<16x1xf32>
      %c0_31 = arith.constant 0 : index
      %c0_32 = arith.constant 0 : index
      %46 = vector.load %arg10[%c0_31, %c0_32] : memref<16x1xf32, #tpu.memory_space<vmem>>, vector<16x1xf32>
      tpu.vector_store %arg10[%c0_31, %c0_32], %45 {strides = array<i32>} : memref<16x1xf32, #tpu.memory_space<vmem>>, vector<16x1xf32>,
      %cst_33 = arith.constant 0.000000e+00 : f32
      %47 = vector.broadcast %cst_33 : f32 to vector<16x1xf32>
      %c0_34 = arith.constant 0 : index
      %c0_35 = arith.constant 0 : index
      %48 = vector.load %arg11[%c0_34, %c0_35] : memref<16x1xf32, #tpu.memory_space<vmem>>, vector<16x1xf32>
      tpu.vector_store %arg11[%c0_34, %c0_35], %47 {strides = array<i32>} : memref<16x1xf32, #tpu.memory_space<vmem>>, vector<16x1xf32>,
      %c16_i32 = arith.constant 16 : i32
      %49 = arith.muli %arg0, %c16_i32 : i32
      %c0_i32_36 = arith.constant 0 : i32
      %50 = arith.addi %49, %c0_i32_36 : i32
      %51 = arith.index_cast %50 : i32 to index
      %52 = memref.load %arg2[%51] : memref<32xi32, #tpu.memory_space<smem>>
      %c0_i32_37 = arith.constant 0 : i32
      %53 = arith.maxsi %52, %c0_i32_37 : i32
      %c255_i32 = arith.constant 255 : i32
      %54 = arith.minsi %53, %c255_i32 : i32
      %55 = arith.index_cast %54 : i32 to index
      %c0_38 = arith.constant 0 : index
      %56 = vector.load %arg4[%55, %c0_38] : memref<256x32xf32, #tpu.memory_space<vmem>>, vector<1x32xf32>
      %c0_39 = arith.constant 0 : index
      %c0_40 = arith.constant 0 : index
      %57 = vector.load %arg8[%c0_39, %c0_40] : memref<16x32xf32, #tpu.memory_space<vmem>>, vector<1x32xf32>
      tpu.vector_store %arg8[%c0_39, %c0_40], %56 {strides = array<i32>} : memref<16x32xf32, #tpu.memory_space<vmem>>, vector<1x32xf32>,
      %c1_i32_41 = arith.constant 1 : i32
      %58 = arith.addi %49, %c1_i32_41 : i32
      %59 = arith.index_cast %58 : i32 to index
      %60 = memref.load %arg2[%59] : memref<32xi32, #tpu.memory_space<smem>>
      %c0_i32_42 = arith.constant 0 : i32
      %61 = arith.maxsi %60, %c0_i32_42 : i32
      %c255_i32_43 = arith.constant 255 : i32
      %62 = arith.minsi %61, %c255_i32_43 : i32
      %63 = arith.index_cast %62 : i32 to index
      %c0_44 = arith.constant 0 : index
      %64 = vector.load %arg4[%63, %c0_44] : memref<256x32xf32, #tpu.memory_space<vmem>>, vector<1x32xf32>
      %c1 = arith.constant 1 : index
      %c0_45 = arith.constant 0 : index
      %65 = vector.load %arg8[%c1, %c0_45] : memref<16x32xf32, #tpu.memory_space<vmem>>, vector<1x32xf32>
      tpu.vector_store %arg8[%c1, %c0_45], %64 {strides = array<i32>} : memref<16x32xf32, #tpu.memory_space<vmem>>, vector<1x32xf32>,
      %c2_i32 = arith.constant 2 : i32
      %66 = arith.addi %49, %c2_i32 : i32
      %67 = arith.index_cast %66 : i32 to index
      %68 = memref.load %arg2[%67] : memref<32xi32, #tpu.memory_space<smem>>
      %c0_i32_46 = arith.constant 0 : i32
      %69 = arith.maxsi %68, %c0_i32_46 : i32
      %c255_i32_47 = arith.constant 255 : i32
      %70 = arith.minsi %69, %c255_i32_47 : i32
      %71 = arith.index_cast %70 : i32 to index
      %c0_48 = arith.constant 0 : index
      %72 = vector.load %arg4[%71, %c0_48] : memref<256x32xf32, #tpu.memory_space<vmem>>, vector<1x32xf32>
      %c2 = arith.constant 2 : index
      %c0_49 = arith.constant 0 : index
      %73 = vector.load %arg8[%c2, %c0_49] : memref<16x32xf32, #tpu.memory_space<vmem>>, vector<1x32xf32>
      tpu.vector_store %arg8[%c2, %c0_49], %72 {strides = array<i32>} : memref<16x32xf32, #tpu.memory_space<vmem>>, vector<1x32xf32>,
      %c3_i32 = arith.constant 3 : i32
      %74 = arith.addi %49, %c3_i32 : i32
      %75 = arith.index_cast %74 : i32 to index
      %76 = memref.load %arg2[%75] : memref<32xi32, #tpu.memory_space<smem>>
      %c0_i32_50 = arith.constant 0 : i32
      %77 = arith.maxsi %76, %c0_i32_50 : i32
      %c255_i32_51 = arith.constant 255 : i32
      %78 = arith.minsi %77, %c255_i32_51 : i32
      %79 = arith.index_cast %78 : i32 to index
      %c0_52 = arith.constant 0 : index
      %80 = vector.load %arg4[%79, %c0_52] : memref<256x32xf32, #tpu.memory_space<vmem>>, vector<1x32xf32>
      %c3 = arith.constant 3 : index
      %c0_53 = arith.constant 0 : index
      %81 = vector.load %arg8[%c3, %c0_53] : memref<16x32xf32, #tpu.memory_space<vmem>>, vector<1x32xf32>
      tpu.vector_store %arg8[%c3, %c0_53], %80 {strides = array<i32>} : memref<16x32xf32, #tpu.memory_space<vmem>>, vector<1x32xf32>,
      %c4_i32 = arith.constant 4 : i32
      %82 = arith.addi %49, %c4_i32 : i32
      %83 = arith.index_cast %82 : i32 to index
      %84 = memref.load %arg2[%83] : memref<32xi32, #tpu.memory_space<smem>>
      %c0_i32_54 = arith.constant 0 : i32
      %85 = arith.maxsi %84, %c0_i32_54 : i32
      %c255_i32_55 = arith.constant 255 : i32
      %86 = arith.minsi %85, %c255_i32_55 : i32
      %87 = arith.index_cast %86 : i32 to index
      %c0_56 = arith.constant 0 : index
      %88 = vector.load %arg4[%87, %c0_56] : memref<256x32xf32, #tpu.memory_space<vmem>>, vector<1x32xf32>
      %c4 = arith.constant 4 : index
      %c0_57 = arith.constant 0 : index
      %89 = vector.load %arg8[%c4, %c0_57] : memref<16x32xf32, #tpu.memory_space<vmem>>, vector<1x32xf32>
      tpu.vector_store %arg8[%c4, %c0_57], %88 {strides = array<i32>} : memref<16x32xf32, #tpu.memory_space<vmem>>, vector<1x32xf32>,
      %c5_i32 = arith.constant 5 : i32
      %90 = arith.addi %49, %c5_i32 : i32
      %91 = arith.index_cast %90 : i32 to index
      %92 = memref.load %arg2[%91] : memref<32xi32, #tpu.memory_space<smem>>
      %c0_i32_58 = arith.constant 0 : i32
      %93 = arith.maxsi %92, %c0_i32_58 : i32
      %c255_i32_59 = arith.constant 255 : i32
      %94 = arith.minsi %93, %c255_i32_59 : i32
      %95 = arith.index_cast %94 : i32 to index
      %c0_60 = arith.constant 0 : index
      %96 = vector.load %arg4[%95, %c0_60] : memref<256x32xf32, #tpu.memory_space<vmem>>, vector<1x32xf32>
      %c5 = arith.constant 5 : index
      %c0_61 = arith.constant 0 : index
      %97 = vector.load %arg8[%c5, %c0_61] : memref<16x32xf32, #tpu.memory_space<vmem>>, vector<1x32xf32>
      tpu.vector_store %arg8[%c5, %c0_61], %96 {strides = array<i32>} : memref<16x32xf32, #tpu.memory_space<vmem>>, vector<1x32xf32>,
      %c6_i32 = arith.constant 6 : i32
      %98 = arith.addi %49, %c6_i32 : i32
      %99 = arith.index_cast %98 : i32 to index
      %100 = memref.load %arg2[%99] : memref<32xi32, #tpu.memory_space<smem>>
      %c0_i32_62 = arith.constant 0 : i32
      %101 = arith.maxsi %100, %c0_i32_62 : i32
      %c255_i32_63 = arith.constant 255 : i32
      %102 = arith.minsi %101, %c255_i32_63 : i32
      %103 = arith.index_cast %102 : i32 to index
      %c0_64 = arith.constant 0 : index
      %104 = vector.load %arg4[%103, %c0_64] : memref<256x32xf32, #tpu.memory_space<vmem>>, vector<1x32xf32>
      %c6 = arith.constant 6 : index
      %c0_65 = arith.constant 0 : index
      %105 = vector.load %arg8[%c6, %c0_65] : memref<16x32xf32, #tpu.memory_space<vmem>>, vector<1x32xf32>
      tpu.vector_store %arg8[%c6, %c0_65], %104 {strides = array<i32>} : memref<16x32xf32, #tpu.memory_space<vmem>>, vector<1x32xf32>,
      %c7_i32 = arith.constant 7 : i32
      %106 = arith.addi %49, %c7_i32 : i32
      %107 = arith.index_cast %106 : i32 to index
      %108 = memref.load %arg2[%107] : memref<32xi32, #tpu.memory_space<smem>>
      %c0_i32_66 = arith.constant 0 : i32
      %109 = arith.maxsi %108, %c0_i32_66 : i32
      %c255_i32_67 = arith.constant 255 : i32
      %110 = arith.minsi %109, %c255_i32_67 : i32
      %111 = arith.index_cast %110 : i32 to index
      %c0_68 = arith.constant 0 : index
      %112 = vector.load %arg4[%111, %c0_68] : memref<256x32xf32, #tpu.memory_space<vmem>>, vector<1x32xf32>
      %c7 = arith.constant 7 : index
      %c0_69 = arith.constant 0 : index
      %113 = vector.load %arg8[%c7, %c0_69] : memref<16x32xf32, #tpu.memory_space<vmem>>, vector<1x32xf32>
      tpu.vector_store %arg8[%c7, %c0_69], %112 {strides = array<i32>} : memref<16x32xf32, #tpu.memory_space<vmem>>, vector<1x32xf32>,
      %c8_i32 = arith.constant 8 : i32
      %114 = arith.addi %49, %c8_i32 : i32
      %115 = arith.index_cast %114 : i32 to index
      %116 = memref.load %arg2[%115] : memref<32xi32, #tpu.memory_space<smem>>
      %c0_i32_70 = arith.constant 0 : i32
      %117 = arith.maxsi %116, %c0_i32_70 : i32
      %c255_i32_71 = arith.constant 255 : i32
      %118 = arith.minsi %117, %c255_i32_71 : i32
      %119 = arith.index_cast %118 : i32 to index
      %c0_72 = arith.constant 0 : index
      %120 = vector.load %arg4[%119, %c0_72] : memref<256x32xf32, #tpu.memory_space<vmem>>, vector<1x32xf32>
      %c8 = arith.constant 8 : index
      %c0_73 = arith.constant 0 : index
      %121 = vector.load %arg8[%c8, %c0_73] : memref<16x32xf32, #tpu.memory_space<vmem>>, vector<1x32xf32>
      tpu.vector_store %arg8[%c8, %c0_73], %120 {strides = array<i32>} : memref<16x32xf32, #tpu.memory_space<vmem>>, vector<1x32xf32>,
      %c9_i32 = arith.constant 9 : i32
      %122 = arith.addi %49, %c9_i32 : i32
      %123 = arith.index_cast %122 : i32 to index
      %124 = memref.load %arg2[%123] : memref<32xi32, #tpu.memory_space<smem>>
      %c0_i32_74 = arith.constant 0 : i32
      %125 = arith.maxsi %124, %c0_i32_74 : i32
      %c255_i32_75 = arith.constant 255 : i32
      %126 = arith.minsi %125, %c255_i32_75 : i32
      %127 = arith.index_cast %126 : i32 to index
      %c0_76 = arith.constant 0 : index
      %128 = vector.load %arg4[%127, %c0_76] : memref<256x32xf32, #tpu.memory_space<vmem>>, vector<1x32xf32>
      %c9 = arith.constant 9 : index
      %c0_77 = arith.constant 0 : index
      %129 = vector.load %arg8[%c9, %c0_77] : memref<16x32xf32, #tpu.memory_space<vmem>>, vector<1x32xf32>
      tpu.vector_store %arg8[%c9, %c0_77], %128 {strides = array<i32>} : memref<16x32xf32, #tpu.memory_space<vmem>>, vector<1x32xf32>,
      %c10_i32 = arith.constant 10 : i32
      %130 = arith.addi %49, %c10_i32 : i32
      %131 = arith.index_cast %130 : i32 to index
      %132 = memref.load %arg2[%131] : memref<32xi32, #tpu.memory_space<smem>>
      %c0_i32_78 = arith.constant 0 : i32
      %133 = arith.maxsi %132, %c0_i32_78 : i32
      %c255_i32_79 = arith.constant 255 : i32
      %134 = arith.minsi %133, %c255_i32_79 : i32
      %135 = arith.index_cast %134 : i32 to index
      %c0_80 = arith.constant 0 : index
      %136 = vector.load %arg4[%135, %c0_80] : memref<256x32xf32, #tpu.memory_space<vmem>>, vector<1x32xf32>
      %c10 = arith.constant 10 : index
      %c0_81 = arith.constant 0 : index
      %137 = vector.load %arg8[%c10, %c0_81] : memref<16x32xf32, #tpu.memory_space<vmem>>, vector<1x32xf32>
      tpu.vector_store %arg8[%c10, %c0_81], %136 {strides = array<i32>} : memref<16x32xf32, #tpu.memory_space<vmem>>, vector<1x32xf32>,
      %c11_i32 = arith.constant 11 : i32
      %138 = arith.addi %49, %c11_i32 : i32
      %139 = arith.index_cast %138 : i32 to index
      %140 = memref.load %arg2[%139] : memref<32xi32, #tpu.memory_space<smem>>
      %c0_i32_82 = arith.constant 0 : i32
      %141 = arith.maxsi %140, %c0_i32_82 : i32
      %c255_i32_83 = arith.constant 255 : i32
      %142 = arith.minsi %141, %c255_i32_83 : i32
      %143 = arith.index_cast %142 : i32 to index
      %c0_84 = arith.constant 0 : index
      %144 = vector.load %arg4[%143, %c0_84] : memref<256x32xf32, #tpu.memory_space<vmem>>, vector<1x32xf32>
      %c11 = arith.constant 11 : index
      %c0_85 = arith.constant 0 : index
      %145 = vector.load %arg8[%c11, %c0_85] : memref<16x32xf32, #tpu.memory_space<vmem>>, vector<1x32xf32>
      tpu.vector_store %arg8[%c11, %c0_85], %144 {strides = array<i32>} : memref<16x32xf32, #tpu.memory_space<vmem>>, vector<1x32xf32>,
      %c12_i32 = arith.constant 12 : i32
      %146 = arith.addi %49, %c12_i32 : i32
      %147 = arith.index_cast %146 : i32 to index
      %148 = memref.load %arg2[%147] : memref<32xi32, #tpu.memory_space<smem>>
      %c0_i32_86 = arith.constant 0 : i32
      %149 = arith.maxsi %148, %c0_i32_86 : i32
      %c255_i32_87 = arith.constant 255 : i32
      %150 = arith.minsi %149, %c255_i32_87 : i32
      %151 = arith.index_cast %150 : i32 to index
      %c0_88 = arith.constant 0 : index
      %152 = vector.load %arg4[%151, %c0_88] : memref<256x32xf32, #tpu.memory_space<vmem>>, vector<1x32xf32>
      %c12 = arith.constant 12 : index
      %c0_89 = arith.constant 0 : index
      %153 = vector.load %arg8[%c12, %c0_89] : memref<16x32xf32, #tpu.memory_space<vmem>>, vector<1x32xf32>
      tpu.vector_store %arg8[%c12, %c0_89], %152 {strides = array<i32>} : memref<16x32xf32, #tpu.memory_space<vmem>>, vector<1x32xf32>,
      %c13_i32 = arith.constant 13 : i32
      %154 = arith.addi %49, %c13_i32 : i32
      %155 = arith.index_cast %154 : i32 to index
      %156 = memref.load %arg2[%155] : memref<32xi32, #tpu.memory_space<smem>>
      %c0_i32_90 = arith.constant 0 : i32
      %157 = arith.maxsi %156, %c0_i32_90 : i32
      %c255_i32_91 = arith.constant 255 : i32
      %158 = arith.minsi %157, %c255_i32_91 : i32
      %159 = arith.index_cast %158 : i32 to index
      %c0_92 = arith.constant 0 : index
      %160 = vector.load %arg4[%159, %c0_92] : memref<256x32xf32, #tpu.memory_space<vmem>>, vector<1x32xf32>
      %c13 = arith.constant 13 : index
      %c0_93 = arith.constant 0 : index
      %161 = vector.load %arg8[%c13, %c0_93] : memref<16x32xf32, #tpu.memory_space<vmem>>, vector<1x32xf32>
      tpu.vector_store %arg8[%c13, %c0_93], %160 {strides = array<i32>} : memref<16x32xf32, #tpu.memory_space<vmem>>, vector<1x32xf32>,
      %c14_i32 = arith.constant 14 : i32
      %162 = arith.addi %49, %c14_i32 : i32
      %163 = arith.index_cast %162 : i32 to index
      %164 = memref.load %arg2[%163] : memref<32xi32, #tpu.memory_space<smem>>
      %c0_i32_94 = arith.constant 0 : i32
      %165 = arith.maxsi %164, %c0_i32_94 : i32
      %c255_i32_95 = arith.constant 255 : i32
      %166 = arith.minsi %165, %c255_i32_95 : i32
      %167 = arith.index_cast %166 : i32 to index
      %c0_96 = arith.constant 0 : index
      %168 = vector.load %arg4[%167, %c0_96] : memref<256x32xf32, #tpu.memory_space<vmem>>, vector<1x32xf32>
      %c14 = arith.constant 14 : index
      %c0_97 = arith.constant 0 : index
      %169 = vector.load %arg8[%c14, %c0_97] : memref<16x32xf32, #tpu.memory_space<vmem>>, vector<1x32xf32>
      tpu.vector_store %arg8[%c14, %c0_97], %168 {strides = array<i32>} : memref<16x32xf32, #tpu.memory_space<vmem>>, vector<1x32xf32>,
      %c15_i32 = arith.constant 15 : i32
      %170 = arith.addi %49, %c15_i32 : i32
      %171 = arith.index_cast %170 : i32 to index
      %172 = memref.load %arg2[%171] : memref<32xi32, #tpu.memory_space<smem>>
      %c0_i32_98 = arith.constant 0 : i32
      %173 = arith.maxsi %172, %c0_i32_98 : i32
      %c255_i32_99 = arith.constant 255 : i32
      %174 = arith.minsi %173, %c255_i32_99 : i32
      %175 = arith.index_cast %174 : i32 to index
      %c0_100 = arith.constant 0 : index
      %176 = vector.load %arg4[%175, %c0_100] : memref<256x32xf32, #tpu.memory_space<vmem>>, vector<1x32xf32>
      %c15 = arith.constant 15 : index
      %c0_101 = arith.constant 0 : index
      %177 = vector.load %arg8[%c15, %c0_101] : memref<16x32xf32, #tpu.memory_space<vmem>>, vector<1x32xf32>
      tpu.vector_store %arg8[%c15, %c0_101], %176 {strides = array<i32>} : memref<16x32xf32, #tpu.memory_space<vmem>>, vector<1x32xf32>,
    } else {
    }
    %c0 = arith.constant 0 : index
    %c0_1 = arith.constant 0 : index
    %3 = vector.load %arg8[%c0, %c0_1] : memref<16x32xf32, #tpu.memory_space<vmem>>, vector<16x32xf32>
    %4 = arith.truncf %3 : vector<16x32xf32> to vector<16x32xbf16>
    %c0_2 = arith.constant 0 : index
    %c0_3 = arith.constant 0 : index
    %5 = vector.load %arg5[%c0_2, %c0_3] : memref<32x128xbf16, #tpu.memory_space<vmem>>, vector<32x128xbf16>
    %cst = arith.constant dense<0.000000e+00> : vector<16x128xf32>
    %6 = tpu.matmul %4, %5, %cst {dimension_numbers = #tpu.dot_dimension_numbers<[1], [0], [0], [1], [0, 0, 1, 1], [], []>} : vector<16x32xbf16>, vector<32x128xbf16>, vector<16x128xf32> -> vector<16x128xf32>
    %7 = arith.truncf %6 : vector<16x128xf32> to vector<16x128xbf16>
    %c0_4 = arith.constant 0 : index
    %c0_5 = arith.constant 0 : index
    %8 = vector.load %arg6[%c0_4, %c0_5] : memref<16x128xbf16, #tpu.memory_space<vmem>>, vector<16x128xbf16>
    tpu.vector_store %arg6[%c0_4, %c0_5], %7 {strides = array<i32>} : memref<16x128xbf16, #tpu.memory_space<vmem>>, vector<16x128xbf16>,
    %c0_6 = arith.constant 0 : index
    %c0_7 = arith.constant 0 : index
    %9 = vector.load %arg3[%c0_6, %c0_7] : memref<16x1xi32, #tpu.memory_space<vmem>>, vector<16x1xi32>
    %10 = tpu.iota {dimensions = array<i32: 1>} : vector<16x128xi32>
    %c128_i32 = arith.constant 128 : i32
    %11 = arith.muli %arg1, %c128_i32 : i32
    %12 = vector.broadcast %11 : i32 to vector<16x128xi32>
    %13 = arith.addi %10, %12 : vector<16x128xi32>
    %c0_8 = arith.constant 0 : index
    %c0_9 = arith.constant 0 : index
    %14 = vector.load %arg9[%c0_8, %c0_9] : memref<16x1xf32, #tpu.memory_space<vmem>>, vector<16x1xf32>
    %cst_10 = arith.constant dense<0xFF800000> : vector<16xf32>
    %15 = vector.multi_reduction <maximumf>, %6, %cst_10 [1] : vector<16x128xf32> to vector<16xf32>
    %16 = vector.shape_cast %15 : vector<16xf32> to vector<16x1xf32>
    %17 = arith.maximumf %14, %16 : vector<16x1xf32>
    %c0_11 = arith.constant 0 : index
    %c0_12 = arith.constant 0 : index
    %18 = vector.load %arg9[%c0_11, %c0_12] : memref<16x1xf32, #tpu.memory_space<vmem>>, vector<16x1xf32>
    %19 = arith.subf %18, %17 : vector<16x1xf32>
    %20 = math.exp %19 : vector<16x1xf32>
    %c0_13 = arith.constant 0 : index
    %c0_14 = arith.constant 0 : index
    %21 = vector.load %arg10[%c0_13, %c0_14] : memref<16x1xf32, #tpu.memory_space<vmem>>, vector<16x1xf32>
    %22 = arith.mulf %20, %21 : vector<16x1xf32>
    %23 = vector.broadcast %17 : vector<16x1xf32> to vector<16x128xf32>
    %24 = arith.subf %6, %23 : vector<16x128xf32>
    %25 = math.exp %24 : vector<16x128xf32>
    %cst_15 = arith.constant dense<0.000000e+00> : vector<16xf32>
    %26 = vector.multi_reduction <add>, %25, %cst_15 [1] : vector<16x128xf32> to vector<16xf32>
    %27 = vector.shape_cast %26 : vector<16xf32> to vector<16x1xf32>
    %28 = arith.addf %22, %27 : vector<16x1xf32>
    %c0_16 = arith.constant 0 : index
    %c0_17 = arith.constant 0 : index
    %29 = vector.load %arg10[%c0_16, %c0_17] : memref<16x1xf32, #tpu.memory_space<vmem>>, vector<16x1xf32>
    tpu.vector_store %arg10[%c0_16, %c0_17], %28 {strides = array<i32>} : memref<16x1xf32, #tpu.memory_space<vmem>>, vector<16x1xf32>,
    %c0_18 = arith.constant 0 : index
    %c0_19 = arith.constant 0 : index
    %30 = vector.load %arg9[%c0_18, %c0_19] : memref<16x1xf32, #tpu.memory_space<vmem>>, vector<16x1xf32>
    tpu.vector_store %arg9[%c0_18, %c0_19], %17 {strides = array<i32>} : memref<16x1xf32, #tpu.memory_space<vmem>>, vector<16x1xf32>,
    %c0_20 = arith.constant 0 : index
    %c0_21 = arith.constant 0 : index
    %31 = vector.load %arg11[%c0_20, %c0_21] : memref<16x1xf32, #tpu.memory_space<vmem>>, vector<16x1xf32>
    %32 = vector.broadcast %9 : vector<16x1xi32> to vector<16x128xi32>
    %33 = arith.cmpi eq, %13, %32 : vector<16x128xi32>
    %cst_22 = arith.constant 0.000000e+00 : f32
    %34 = vector.broadcast %cst_22 : f32 to vector<16x128xf32>
    %35 = arith.select %33, %6, %34 : vector<16x128xi1>, vector<16x128xf32>
    %cst_23 = arith.constant dense<0.000000e+00> : vector<16xf32>
    %36 = vector.multi_reduction <add>, %35, %cst_23 [1] : vector<16x128xf32> to vector<16xf32>
    %37 = vector.shape_cast %36 : vector<16xf32> to vector<16x1xf32>
    %38 = arith.addf %31, %37 : vector<16x1xf32>
    %c0_24 = arith.constant 0 : index
    %c0_25 = arith.constant 0 : index
    %39 = vector.load %arg11[%c0_24, %c0_25] : memref<16x1xf32, #tpu.memory_space<vmem>>, vector<16x1xf32>
    tpu.vector_store %arg11[%c0_24, %c0_25], %38 {strides = array<i32>} : memref<16x1xf32, #tpu.memory_space<vmem>>, vector<16x1xf32>,
    %c1_i32 = arith.constant 1 : i32
    %40 = arith.cmpi eq, %arg1, %c1_i32 : i32
    %41 = arith.extui %40 : i1 to i32
    %c0_i32_26 = arith.constant 0 : i32
    %42 = arith.cmpi ne, %41, %c0_i32_26 : i32
    scf.if %42 {
      %c0_27 = arith.constant 0 : index
      %c0_28 = arith.constant 0 : index
      %43 = vector.load %arg9[%c0_27, %c0_28] : memref<16x1xf32, #tpu.memory_space<vmem>>, vector<16x1xf32>
      %c0_29 = arith.constant 0 : index
      %c0_30 = arith.constant 0 : index
      %44 = vector.load %arg10[%c0_29, %c0_30] : memref<16x1xf32, #tpu.memory_space<vmem>>, vector<16x1xf32>
      %45 = math.log %44 : vector<16x1xf32>
      %46 = arith.addf %43, %45 : vector<16x1xf32>
      %c-100_i32 = arith.constant -100 : i32
      %47 = vector.broadcast %c-100_i32 : i32 to vector<16x1xi32>
      %48 = arith.cmpi ne, %9, %47 : vector<16x1xi32>
      %c0_31 = arith.constant 0 : index
      %c0_32 = arith.constant 0 : index
      %49 = vector.load %arg11[%c0_31, %c0_32] : memref<16x1xf32, #tpu.memory_space<vmem>>, vector<16x1xf32>
      %50 = arith.subf %46, %49 : vector<16x1xf32>
      %cst_33 = arith.constant 0.000000e+00 : f32
      %51 = vector.broadcast %cst_33 : f32 to vector<16x1xf32>
      %52 = arith.select %48, %50, %51 : vector<16x1xi1>, vector<16x1xf32>
      %c0_34 = arith.constant 0 : index
      %c0_35 = arith.constant 0 : index
      %53 = vector.load %arg7[%c0_34, %c0_35] : memref<16x1xf32, #tpu.memory_space<vmem>>, vector<16x1xf32>
      tpu.vector_store %arg7[%c0_34, %c0_35], %52 {strides = array<i32>} : memref<16x1xf32, #tpu.memory_space<vmem>>, vector<16x1xf32>,
    } else {
    }
    return
  }
  func.func @transform_0(%arg0: i32, %arg1: i32, %arg2: memref<32xi32, #tpu.memory_space<smem>>) -> (i32, i32) {
    %c0_i32 = arith.constant 0 : i32
    %c0_i32_0 = arith.constant 0 : i32
    return %arg0, %c0_i32 : i32, i32
  }
  func.func @transform_1(%arg0: i32, %arg1: i32, %arg2: memref<32xi32, #tpu.memory_space<smem>>) -> (i32, i32) {
    %c0_i32 = arith.constant 0 : i32
    %c0_i32_0 = arith.constant 0 : i32
    %c0_i32_1 = arith.constant 0 : i32
    return %c0_i32, %c0_i32_0 : i32, i32
  }
  func.func @transform_2(%arg0: i32, %arg1: i32, %arg2: memref<32xi32, #tpu.memory_space<smem>>) -> (i32, i32) {
    %c0_i32 = arith.constant 0 : i32
    %c0_i32_0 = arith.constant 0 : i32
    return %c0_i32, %arg1 : i32, i32
  }
  func.func @transform_3(%arg0: i32, %arg1: i32, %arg2: memref<32xi32, #tpu.memory_space<smem>>) -> (i32, i32) {
    %c0_i32 = arith.constant 0 : i32
    return %arg0, %arg1 : i32, i32
  }
  func.func @transform_4(%arg0: i32, %arg1: i32, %arg2: memref<32xi32, #tpu.memory_space<smem>>) -> (i32, i32) {
    %c0_i32 = arith.constant 0 : i32
    %c0_i32_0 = arith.constant 0 : i32
    return %arg0, %c0_i32 : i32, i32
  }
}

</mosaic_0001>

<bundles_post_ra>
// kernel: tpu_custom_call.1
= control target key start
LH: loop header
LB: loop body
LE: loop exit
PB: predicated region body
PF: predicated region fallthrough
CT: control target
= control target key end

     0   :  { %s1564_s0 = inlined_call_operand.vmem [shape: s32[32], index: 0, kind: input, shape index: {}]   ;;  %s1565_s1 = inlined_call_operand.vmem [shape: s32[32,1], index: 1, kind: input, shape index: {}]   ;;  %s1566_s2 = inlined_call_operand.vmem [shape: f32[256,32], index: 2, kind: input, shape index: {}]   ;;  %s1567_s3 = inlined_call_operand.vmem [shape: bf16[32,256], index: 3, kind: input, shape index: {}]   ;;  %s1568_s4 = inlined_call_operand.hbm [shape: bf16[32,256], index: 4, kind: output, shape index: {0}]   ;;  %s1569_s5 = inlined_call_operand.vmem [shape: f32[32,1], index: 5, kind: output, shape index: {1}]  }
   0x1   :  { %1577 = sst [smem:[#allocation21_spill]] %s1565_s1  ;;  %s11_s20 = sshll.u32 %s1564_s0, 4  ;;  %s12_s20 = int_to_ptr.vmem [resolvable:$true] %s11_s20 }
   0x2   :  { %1578 = sst [smem:[#allocation22_spill]] %s1567_s3  ;;  %s1064_s21 = scalar_lea.vmem %s12_s20, 16 }
   0x3   :  { %1579 = sst [smem:[#allocation23_spill]] %s1569_s5  ;;  %p1065_p0 = scmp.ne.s32.totalorder %s12_s20, %s1064_s21 }
   0x4   :  { %p1069_p1 = scmp.lt.s32.totalorder %s12_s20, %s12_s20  ;;  %p1070_p2 = scmp.lt.s32.totalorder %s1064_s21, %s1064_s21 }
   0x6   :  { %p1071_p3 = por %p1070_p2, %p1069_p1 }
   0x8   :  { %p1072_p4 = pnand %p1071_p3, %p1065_p0 }
   0xa   :  { %1075 = shalt.err (!%p1072_p4)  }
   0xb   :  { %s1190_s22 = smov [#allocation7]  }
   0xc   :  { %14 = dma.vmem_to_smem %s12_s20, 16, %s1190_s22, [#allocation6] }
   0xd   :  { %1144 = dma.done.wait [#allocation6], 16 }
   0xe   :  { %1145 = vsyncadd [#allocation6], 4294967280 }
   0xf   :  { %16 = sfence }
  0x10   :  { %17 = vsyncpa [#allocation10], 0 }
  0x11   :  { %19 = vsyncpa [#allocation10 + $0x1], 0  ;;  %s1233_s23 = smov 0   ;;  %s1235_s24 = smov 0  }
  0x12   :  { %s1237_s0 = smov 0   ;;  %s1239_s25 = smov 0  }
  0x13   :  { %s1241_s26 = smov 0   ;;  %s1243_s27 = smov 0  }
  0x14   :  { %s1245_s28 = smov 0   ;;  %s1247_s29 = smov 0  }
  0x15   :  { %s1249_s30 = smov 0   ;;  %s1251_s6 = smov 0  }
  0x16 LB: > { %1580 = sst [smem:[#allocation13_spill]] %s1160_s0  ;;  %s793_s7 = sadd.s32 4294967295, %s1188_s6   ;;  %s1188_s6 = sphi %s1251_s6, %s25_s6   ;;  %s1184_s30 = sphi %s1249_s30, %s1607_s30   ;;  %s1180_s29 = sphi %s1247_s29, %s1610_s29   ;;  %s1176_s28 = sphi %s1245_s28, %s1605_s28   ;;  %s1172_s27 = sphi %s1243_s27, %s1604_s27   ;;  %s1168_s26 = sphi %s1241_s26, %s1603_s26   ;;  %s1164_s25 = sphi %s1239_s25, %s1602_s25   ;;  %s1160_s0 = sphi %s1237_s0, %s1601_s0   ;;  %s1156_s24 = sphi %s1235_s24, %s1609_s24   ;;  %s1152_s23 = sphi %s1233_s23, %s1608_s23  }
  0x17   : > { %1581 = sst [smem:[#allocation14_spill]] %s1168_s26  ;;  %s794_s8 = sadd.s32 4294967294, %s1188_s6  }
  0x18   : > { %1582 = sst [smem:[#allocation15_spill]] %s1180_s29  ;;  %s34_s9 = sadd.s32 1, %s1180_s29 }
  0x19   : > { %1583 = sst [smem:[#allocation16_spill]] %s1184_s30  ;;  %s37_s10 = sadd.s32 1, %s1184_s30 }
  0x1a   : > { %p35_p5 = scmp.ge.s32.totalorder %s34_s9, 2  ;;  %s91_s11 = sadd.s32 1, %s1168_s26 }
  0x1b   : > { %p98_p6 = scmp.ne.s32.totalorder %s1168_s26, %s1164_s25  ;;  %p99_p7 = scmp.eq.s32.totalorder %s1188_s6, 0 }
  0x1c   : > { %s1612_s9 = smov (%p35_p5, %s34_s9), 0  ;;  %s1614_s10 = smov (!%p35_p5, %s37_s10), %s1184_s30 }
  0x1d   : > { %1584 = sst [smem:[#allocation17_spill]] %s1612_s9  ;;  %s88_s12 = ssub.s32 %s1180_s29, %s1612_s9 }
  0x1e   : > { %p1296_p8 = por %p99_p7, %p98_p6  ;;  %p39_p9 = scmp.ge.s32.totalorder %s1614_s10, 2 }
  0x1f   : > { %p89_p10 = scmp.eq.s32.totalorder %s88_s12, 0  ;;  %s119_s14 = sadd.s32 1, %s1160_s0 }
  0x20   : > { %p129_p11 = scmp.ne.s32.totalorder %s1160_s0, %s1156_s24  ;;  %s1616_s10 = smov (%p39_p9, %s1614_s10), 0 }
  0x21   : > { %1586 = sst [smem:[#allocation18_spill]] %s1616_s10  ;;  %s114_s16 = ssub.s32 %s1184_s30, %s1616_s10 }
  0x22   : > { %s1306_s15 = scalar_select %p89_p10, %s1168_s26, %s91_s11  }
  0x23   : > { %p130_p12 = scmp.eq.s32.totalorder %s793_s7, 3  ;;  %s116_s17 = sor.u32 %s114_s16, %s88_s12 }
  0x24   : > { %1587 = sst [smem:[#allocation19_spill]] %s1306_s15  ;;  %p135_p13 = scmp.ne.s32.totalorder %s1156_s24, %s1152_s23 }
  0x25   : > { %p117_p0 = scmp.eq.s32.totalorder %s116_s17, 0  ;;  %p1312_p1 = por %p130_p12, %p129_p11 }
  0x26   : > { %p136_p2 = scmp.eq.s32.totalorder %s794_s8, 3  ;;  %p796_p4 = scmp.ge.s32.totalorder %s1188_s6, 4 }
  0x27   : > { %s1317_s19 = scalar_select %p117_p0, %s1160_s0, %s119_s14  }
  0x28   : > { %p1319_p3 = por %p136_p2, %p135_p13  ;;  %181 = sbr.rel (%p796_p4) target bundleno = 59 (0x3b), region = 20 }
  0x29   : > { %1589 = sst [smem:[#allocation20_spill]] %s1317_s19 }
  0x2f   : > { %193 = sbr.rel (!%p1296_p8) target bundleno = 59 (0x3b), region = 28  ;;  %s195_s21 = sand.u32 (%p1296_p8), 1, %s1168_s26  }
  0x30   : > { %s798_s22 = sshll.u32 (%p1296_p8), %s1180_s29, 2  ;;  %s797_s7 = sshll.u32 (%p1296_p8), %s195_s21, 4 }
  0x31   : > { %s1591_s3 = sld [smem:[#allocation22_spill]] (%p1296_p8)  ;;  %s197_s14 = scalar_lea.vmem (%p1296_p8), [#allocation8], %s797_s7 }
  0x37   : > { %s199_s8 = scalar_lea.vmem %s1591_s3, %s798_s22 }
  0x38   : > { %v215_v0 = vld [vmem:[%s199_s8] sm:$0xf]  ;;  %v217_v1 = vld [vmem:[%s199_s8 + $0x8] sm:$0xf]  ;;  %v219_v2 = vld [vmem:[%s199_s8 + $0x10] sm:$0xf] }
  0x39   : > { %216 = vst [vmem:[%s197_s14] sm:$0xf] %v215_v0  ;;  %218 = vst [vmem:[%s197_s14 + $0x4] sm:$0xf] %v217_v1  ;;  %v221_v3 = vld [vmem:[%s199_s8 + $0x18] sm:$0xf] }
  0x3a   : > { %220 = vst [vmem:[%s197_s14 + $0x8] sm:$0xf] %v219_v2  ;;  %222 = vst [vmem:[%s197_s14 + $0xc] sm:$0xf] %v221_v3 }
  0x3b PF: > { %p799_p5 = scmp.ge.s32.totalorder %s1188_s6, 1  ;;  %p252_p6 = scmp.lt.s32.totalorder %s1188_s6, 5 }
  0x3d   : > { %p253_p7 = pnand %p799_p5, %p252_p6 }
  0x3e   : > { %s259_s13 = sand.u32 (!%p253_p7), 1, %s1164_s25   ;;  %s1571_s16 = sand.u32 (!%p253_p7), 1, %s1156_s24  }
  0x3f   : > { %256 = sbr.rel (%p253_p7) target bundleno = 847 (0x34f), region = 69  ;;  %s1335_s17 = sshll.u32 (!%p253_p7), %s259_s13, 4 }
  0x40   : > { %s1339_s21 = sshll.u32 (!%p253_p7), %s1571_s16, 3  ;;  %s802_s22 = sshll.u32 (!%p253_p7), %s1176_s28, 1 }
  0x41   : > { %p295_p8 = scmp.lt.s32.totalorder (!%p253_p7), %s802_s22, 3  ;;  %s1592_s1 = sld [smem:[#allocation21_spill]] (!%p253_p7) }
  0x42   : > { %s1593_s5 = sld [smem:[#allocation23_spill]] (!%p253_p7)  ;;  %p806_p9 = scmp.ne.s32.totalorder (!%p253_p7), %s1172_s27, 0 }
  0x46   : > { %s1618_s22 = smov (!%p295_p8, %s802_s22), 3  ;;  %311 = sbr.rel (%p806_p9) target bundleno = 136 (0x88), region = 77 }
  0x47   : > { %s803_s7 = sshll.u32 %s1618_s22, 3  ;;  %vm312_vm0 = vcmask (!%p806_p9), 7168   ;;  %s1356_s16 = sshll.u32 (!%p806_p9), %s1176_s28, 4  ;;  %v1191_v4 = vmov (!%p806_p9), -inf   ;;  %v1192_v5 = vmov (!%p806_p9), 0.0   ;;  %vm327_vm1 = vcmask (!%p806_p9), 253952  }
  0x48   : > { %s1345_s8 = scalar_lea.vmem %s1592_s1, %s803_s7  ;;  %s1350_s25 = scalar_lea.vmem %s1593_s5, %s803_s7  ;;  %313 = vst.msk [vmem:[#allocation3] sm:$0xff] (!%p806_p9), %vm312_vm0, %v1191_v4  ;;  %314 = vst.msk [vmem:[#allocation3 + $0x8] sm:$0xff] (!%p806_p9), %vm312_vm0, %v1191_v4 }
  0x49   : > { %315 = vst.msk [vmem:[#allocation4] sm:$0xff] (!%p806_p9), %vm312_vm0, %v1192_v5  ;;  %316 = vst.msk [vmem:[#allocation4 + $0x8] sm:$0xff] (!%p806_p9), %vm312_vm0, %v1192_v5  ;;  %s320_s3 = sld [smem:[#allocation7 + %s1356_s16]] (!%p806_p9)  ;;  %s329_s22 = sadd.s32 (!%p806_p9), 1, %s1356_s16 }
  0x4a   : > { %317 = vst.msk [vmem:[#allocation5] sm:$0xff] (!%p806_p9), %vm312_vm0, %v1192_v5  ;;  %318 = vst.msk [vmem:[#allocation5 + $0x8] sm:$0xff] (!%p806_p9), %vm312_vm0, %v1192_v5  ;;  %s330_s7 = sld [smem:[#allocation7 + %s329_s22]] (!%p806_p9)  ;;  %s338_s11 = sadd.s32 (!%p806_p9), 2, %s1356_s16 }
  0x4b   : > { %s339_s12 = sld [smem:[#allocation7 + %s338_s11]] (!%p806_p9)  ;;  %s347_s14 = sadd.s32 (!%p806_p9), 3, %s1356_s16 }
  0x4c   : > { %s1362_s10 = sld [smem:[#allocation7 + %s347_s14]] (!%p806_p9)  ;;  %s356_s13 = sadd.s32 (!%p806_p9), 4, %s1356_s16 }
  0x4d   : > { %s1365_s1 = sld [smem:[#allocation7 + %s356_s13]]  ;;  %s365_s5 = sadd.s32 5, %s1356_s16 }
  0x4e   : > { %s1368_s9 = sld [smem:[#allocation7 + %s365_s5]]  ;;  %s1594_s22 = sadd.s32 6, %s1356_s16 }
  0x4f   : > { %p321_p10 = scmp.gt.s32.totalorder %s320_s3, 0  ;;  %p808_p11 = scmp.lt.s32.totalorder %s320_s3, 255 }
  0x50   : > { %p331_p12 = scmp.gt.s32.totalorder %s330_s7, 0  ;;  %p813_p13 = scmp.lt.s32.totalorder %s330_s7, 255 }
  0x51   : > { %s1620_s3 = smov (!%p321_p10, %s320_s3), 0  ;;  %p340_p0 = scmp.gt.s32.totalorder %s339_s12, 0 }
  0x52   : > { %s1622_s7 = smov (!%p331_p12, %s330_s7), 0  ;;  %s1624_s3 = smov (!%p808_p11, %s1620_s3), 255 }
  0x53   : > { %s1626_s7 = smov (!%p813_p13, %s1622_s7), 255  ;;  %s325_s11 = scalar_lea.vmem %s1566_s2, %s1624_s3 }
  0x54   : > { %v326_v6 = vld [vmem:[%s325_s11] sm:$0x1]  ;;  %s335_s30 = scalar_lea.vmem %s1566_s2, %s1626_s7  ;;  %p818_p2 = scmp.lt.s32.totalorder %s339_s12, 255 }
  0x55   : > { %328 = vst.msk [vmem:[#allocation2] sm:$0x1] %vm327_vm1, %v326_v6  ;;  %v336_v7 = vld [vmem:[%s335_s30] sm:$0x1]  ;;  %s1628_s12 = smov (!%p340_p0, %s339_s12), 0  ;;  %p349_p4 = scmp.gt.s32.totalorder %s1362_s10, 0 }
  0x56   : > { %337 = vst.msk [vmem:[#allocation2 + $0x1] sm:$0x1] %vm327_vm1, %v336_v7  ;;  %p823_p5 = scmp.lt.s32.totalorder %s1362_s10, 255  ;;  %s1630_s12 = smov (!%p818_p2, %s1628_s12), 255 }
  0x57   : > { %s1632_s10 = smov (!%p349_p4, %s1362_s10), 0  ;;  %s344_s7 = scalar_lea.vmem %s1566_s2, %s1630_s12 }
  0x58   : > { %p358_p6 = scmp.gt.s32.totalorder %s1365_s1, 0  ;;  %v345_v8 = vld [vmem:[%s344_s7] sm:$0x1]  ;;  %s1634_s10 = smov (!%p823_p5, %s1632_s10), 255 }
  0x59   : > { %346 = vst.msk [vmem:[#allocation2 + $0x2] sm:$0x1] %vm327_vm1, %v345_v8  ;;  %s353_s5 = scalar_lea.vmem %s1566_s2, %s1634_s10  ;;  %p828_p7 = scmp.lt.s32.totalorder %s1365_s1, 255 }
  0x5a   : > { %s359_s30 = scalar_select %p358_p6, %s1365_s1, 0  ;;  %v354_v9 = vld [vmem:[%s353_s5] sm:$0x1] }
  0x5b   : > { %p367_p8 = scmp.gt.s32.totalorder %s1368_s9, 0  ;;  %p833_p9 = scmp.lt.s32.totalorder %s1368_s9, 255  ;;  %355 = vst.msk [vmem:[#allocation2 + $0x3] sm:$0x1] %vm327_vm1, %v354_v9 }
  0x5c   : > { %s1636_s30 = smov (!%p828_p7, %s359_s30), 255  ;;  %s375_s7 = sld [smem:[#allocation7 + %s1594_s22]] }
  0x5d   : > { %s1638_s9 = smov (!%p367_p8, %s1368_s9), 0  ;;  %s362_s3 = scalar_lea.vmem %s1566_s2, %s1636_s30 }
  0x5e   : > { %v363_v10 = vld [vmem:[%s362_s3] sm:$0x1]  ;;  %s1640_s9 = smov (!%p833_p9, %s1638_s9), 255  ;;  %s383_s1 = sadd.s32 7, %s1356_s16 }
  0x5f   : > { %364 = vst.msk [vmem:[#allocation2 + $0x4] sm:$0x1] %vm327_vm1, %v363_v10  ;;  %s392_s10 = sadd.s32 8, %s1356_s16  ;;  %s371_s5 = scalar_lea.vmem %s1566_s2, %s1640_s9 }
  0x60   : > { %s384_s29 = sld [smem:[#allocation7 + %s383_s1]]  ;;  %v372_v11 = vld [vmem:[%s371_s5] sm:$0x1]  ;;  %s401_s26 = sadd.s32 9, %s1356_s16 }
  0x61   : > { %s393_s15 = sld [smem:[#allocation7 + %s392_s10]]  ;;  %373 = vst.msk [vmem:[#allocation2 + $0x5] sm:$0x1] %vm327_vm1, %v372_v11  ;;  %s410_s12 = sadd.s32 10, %s1356_s16 }
  0x62   : > { %s402_s30 = sld [smem:[#allocation7 + %s401_s26]]  ;;  %p376_p10 = scmp.gt.s32.totalorder %s375_s7, 0 }
  0x63   : > { %p838_p11 = scmp.lt.s32.totalorder %s375_s7, 255  ;;  %s1410_s14 = sld [smem:[#allocation7 + %s410_s12]] }
  0x64   : > { %s419_s3 = sadd.s32 11, %s1356_s16  ;;  %s1642_s7 = smov (!%p376_p10, %s375_s7), 0 }
  0x65   : > { %s1644_s7 = smov (!%p838_p11, %s1642_s7), 255  ;;  %s428_s10 = sadd.s32 12, %s1356_s16 }
  0x66   : > { %p385_p12 = scmp.gt.s32.totalorder %s384_s29, 0  ;;  %p843_p13 = scmp.lt.s32.totalorder %s384_s29, 255 }
  0x67   : > { %s380_s1 = scalar_lea.vmem %s1566_s2, %s1644_s7  ;;  %p394_p0 = scmp.gt.s32.totalorder %s393_s15, 0 }
  0x68   : > { %s1646_s29 = smov (!%p385_p12, %s384_s29), 0  ;;  %v381_v12 = vld [vmem:[%s380_s1] sm:$0x1]  ;;  %p848_p2 = scmp.lt.s32.totalorder %s393_s15, 255 }
  0x69   : > { %s1648_s29 = smov (!%p843_p13, %s1646_s29), 255  ;;  %382 = vst.msk [vmem:[#allocation2 + $0x6] sm:$0x1] %vm327_vm1, %v381_v12  ;;  %p403_p4 = scmp.gt.s32.totalorder %s402_s30, 0 }
  0x6a   : > { %s395_s26 = scalar_select %p394_p0, %s393_s15, 0 }
  0x6b   : > { %s389_s11 = scalar_lea.vmem %s1566_s2, %s1648_s29  ;;  %p853_p5 = scmp.lt.s32.totalorder %s402_s30, 255 }
  0x6c   : > { %v390_v13 = vld [vmem:[%s389_s11] sm:$0x1]  ;;  %s1650_s26 = smov (!%p848_p2, %s395_s26), 255  ;;  %s1652_s30 = smov (!%p403_p4, %s402_s30), 0 }
  0x6d   : > { %391 = vst.msk [vmem:[#allocation2 + $0x7] sm:$0x1] %vm327_vm1, %v390_v13  ;;  %s398_s12 = scalar_lea.vmem %s1566_s2, %s1650_s26  ;;  %p412_p6 = scmp.gt.s32.totalorder %s1410_s14, 0 }
  0x6e   : > { %v399_v14 = vld [vmem:[%s398_s12] sm:$0x1]  ;;  %s1654_s30 = smov (!%p853_p5, %s1652_s30), 255  ;;  %p858_p7 = scmp.lt.s32.totalorder %s1410_s14, 255 }
  0x6f   : > { %400 = vst.msk [vmem:[#allocation2 + $0x8] sm:$0x1] %vm327_vm1, %v399_v14  ;;  %s413_s29 = scalar_select %p412_p6, %s1410_s14, 0 }
  0x70   : > { %s407_s9 = scalar_lea.vmem %s1566_s2, %s1654_s30  ;;  %s420_s1 = sld [smem:[#allocation7 + %s419_s3]] }
  0x71   : > { %v408_v15 = vld [vmem:[%s407_s9] sm:$0x1]  ;;  %s1656_s29 = smov (!%p858_p7, %s413_s29), 255  ;;  %s429_s26 = sld [smem:[#allocation7 + %s428_s10]] }
  0x72   : > { %409 = vst.msk [vmem:[#allocation2 + $0x9] sm:$0x1] %vm327_vm1, %v408_v15  ;;  %s437_s13 = sadd.s32 13, %s1356_s16  ;;  %s416_s5 = scalar_lea.vmem %s1566_s2, %s1656_s29 }
  0x73   : > { %s438_s12 = sld [smem:[#allocation7 + %s437_s13]]  ;;  %v417_v16 = vld [vmem:[%s416_s5] sm:$0x1]  ;;  %s446_s19 = sadd.s32 14, %s1356_s16 }
  0x74   : > { %s455_s0 = sadd.s32 15, %s1356_s16  ;;  %418 = vst.msk [vmem:[#allocation2 + $0xa] sm:$0x1] %vm327_vm1, %v417_v16  ;;  %s447_s30 = sld [smem:[#allocation7 + %s446_s19]] }
  0x75   : > { %s1440_s14 = sld [smem:[#allocation7 + %s455_s0]] }
  0x76   : > { %p421_p8 = scmp.gt.s32.totalorder %s420_s1, 0  ;;  %p863_p9 = scmp.lt.s32.totalorder %s420_s1, 255 }
  0x77   : > { %p430_p10 = scmp.gt.s32.totalorder %s429_s26, 0  ;;  %p868_p11 = scmp.lt.s32.totalorder %s429_s26, 255 }
  0x78   : > { %s1658_s1 = smov (!%p421_p8, %s420_s1), 0 }
  0x79   : > { %s1660_s1 = smov (!%p863_p9, %s1658_s1), 255  ;;  %s1662_s26 = smov (!%p430_p10, %s429_s26), 0 }
  0x7a   : > { %s425_s29 = scalar_lea.vmem %s1566_s2, %s1660_s1  ;;  %p439_p12 = scmp.gt.s32.totalorder %s438_s12, 0 }
  0x7b   : > { %v426_v17 = vld [vmem:[%s425_s29] sm:$0x1]  ;;  %s1664_s26 = smov (!%p868_p11, %s1662_s26), 255  ;;  %p873_p13 = scmp.lt.s32.totalorder %s438_s12, 255 }
  0x7c   : > { %427 = vst.msk [vmem:[#allocation2 + $0xb] sm:$0x1] %vm327_vm1, %v426_v17  ;;  %s440_s16 = scalar_select %p439_p12, %s438_s12, 0 }
  0x7d   : > { %s434_s22 = scalar_lea.vmem %s1566_s2, %s1664_s26  ;;  %p448_p0 = scmp.gt.s32.totalorder %s447_s30, 0 }
  0x7e   : > { %v435_v18 = vld [vmem:[%s434_s22] sm:$0x1]  ;;  %p878_p2 = scmp.lt.s32.totalorder %s447_s30, 255  ;;  %s1666_s16 = smov (!%p873_p13, %s440_s16), 255 }
  0x7f   : > { %436 = vst.msk [vmem:[#allocation2 + $0xc] sm:$0x1] %vm327_vm1, %v435_v18  ;;  %s1668_s30 = smov (!%p448_p0, %s447_s30), 0  ;;  %s443_s10 = scalar_lea.vmem %s1566_s2, %s1666_s16 }
  0x80   : > { %p457_p4 = scmp.gt.s32.totalorder %s1440_s14, 0  ;;  %v444_v19 = vld [vmem:[%s443_s10] sm:$0x1]  ;;  %s1670_s30 = smov (!%p878_p2, %s1668_s30), 255 }
  0x81   : > { %445 = vst.msk [vmem:[#allocation2 + $0xd] sm:$0x1] %vm327_vm1, %v444_v19  ;;  %s452_s7 = scalar_lea.vmem %s1566_s2, %s1670_s30  ;;  %p883_p5 = scmp.lt.s32.totalorder %s1440_s14, 255 }
  0x82   : > { %s458_s13 = scalar_select %p457_p4, %s1440_s14, 0  ;;  %v453_v20 = vld [vmem:[%s452_s7] sm:$0x1] }
  0x83   : > { %454 = vst.msk [vmem:[#allocation2 + $0xe] sm:$0x1] %vm327_vm1, %v453_v20 }
  0x84   : > { %s1672_s13 = smov (!%p883_p5, %s458_s13), 255 }
  0x85   : > { %s461_s3 = scalar_lea.vmem %s1566_s2, %s1672_s13 }
  0x86   : > { %v462_v21 = vld [vmem:[%s461_s3] sm:$0x1] }
  0x87   : > { %463 = vst.msk [vmem:[#allocation2 + $0xf] sm:$0x1] %vm327_vm1, %v462_v21 }
  0x88 PF: > { %s1595_s15 = scalar_lea.vmem [#allocation8], %s1335_s17  ;;  %v1193_v23 = vmov 0.0   ;;  %vm1194_vm2 = vmmov 0   ;;  %v464_v25 = vld [vmem:[#allocation2] sm:$0xff]  ;;  %vm483_vm3 = vcmask 261120   ;;  %v1195_v28 = vmov 0  }
  0x89   : > { %v1050_v22 = vld [vmem:[%s1595_s15] sm:$0xff]   ;;  %944 = vmatprep.subr.bf16.mxu0 %v1193_v23  ;;  %s1596_s30 = smov %s1595_s15  ;;  %948 = vmatprep.mubr.msk.bf16.mxu0 %vm1194_vm2, %v1193_v23  ;;  %s1597_s17 = scalar_lea.vmem [#allocation9], %s1339_s21  ;;  %vm585_vm4 = vcmask 7168   ;;  %v540_v38 = vlaneseq  ;;  %v1479_v46 = vld [vmem:[%s1345_s8 + $0x8] sm:$0xff] }
  0x8a   : > { %945 = vmatpush3.bf16.msra.mxu0 %v1050_v22  ;;  %v1051_v24 = vld [vmem:[%s1596_s30 + $0x8] sm:$0xff]   ;;  %1049 = vset.pattern.permute.xlu0 %v1195_v28  ;;  %v1472_v34 = vld [vmem:[%s1345_s8] sm:$0xff]  ;;  %v545_v35 = vld [vmem:[#allocation3] sm:$0xff]  ;;  %s893_s14 = sshll.u32 %s1172_s27, 7  ;;  %p894_p6 = scmp.ne.s32.totalorder %s1172_s27, 1 }
  0x8b   : > { %946 = vmatprep.subr.bf16.mxu0 %v1193_v23  ;;  %1048 = vset.pattern.permute.xlu1 %v1195_v28  ;;  %v546_v39 = vld [vmem:[#allocation3 + $0x8] sm:$0xff]  ;;  %v541_v43 = vand.u32 127, %v540_v38  ;;  %v543_v44 = vstv %s893_s14  ;;  %v559_v2 = vld [vmem:[#allocation4] sm:$0xff]  ;;  %v560_v6 = vld [vmem:[#allocation4 + $0x8] sm:$0xff]  ;;  %vm624_vm7 = vcmp.ne.s32.totalorder (!%p894_p6), %v1472_v34, 4294967196  ;;  %vm625_vm8 = vcmp.ne.s32.totalorder (!%p894_p6), %v1479_v46, 4294967196 }
  0x8c   : > { %v590_v60 = vld [vmem:[#allocation5] sm:$0xff]  ;;  %v591_v11 = vld [vmem:[#allocation5 + $0x8] sm:$0xff] }
  0x8d   : > { %v544_v47 = vadd.s32 %v543_v44, %v541_v43 }
  0x8e   : > { %v465_v26 = vld [vmem:[#allocation2 + $0x8] sm:$0xff]  ;;  %947 = vmatpush3.bf16.msra.mxu0 %v1051_v24 }
  0x8f   : > { %v466_v27 = vpack.c.bf16 %v465_v26, %v464_v25 }
  0x91   : > { %949 = vmatmul.mubr.msk.bf16.vlgmr.msra.gmra.mrb[0].mxu0 %vm483_vm3, %v466_v27 }
 0x164   : > { %v521_v29 = vpop.f32.mrb[0].mxu0 }
 0x165   : > { %547 = vmax.xlane.f32.xlu0 %v521_v29  ;;  %v950_v30 = vpop.f32.mrb[1].mxu0 }
 0x166   : > { %v524_v31 = vpop.f32.mrb[2].mxu0 }
 0x167   : > { %v939_v32 = vpack.c.bf16 %v524_v31, %v521_v29  ;;  %v951_v33 = vpop.f32.mrb[3].mxu0 }
 0x169   : > { %940 = vst [vmem:[%s1597_s17] sm:$0xff] %v939_v32   ;;  %549 = vmax.xlane.f32.xlu0 %v524_v31 }
 0x17f   : > { %593 = vperm.xlu0 %1049, %v1472_v34  }
 0x1f2   : > { %v548_v36 = vpop.xlane.xlu0 %547 }
 0x1f3   : > { %v551_v37 = vmax.f32 %v545_v35, %v548_v36 }
 0x1f5   : > { %v553_v40 = vsub.f32 %v545_v35, %v551_v37  ;;  %588 = vst.msk [vmem:[#allocation3] sm:$0xff] %vm585_vm4, %v551_v37  ;;  %565 = vperm.xlu1 %1048, %v551_v37  }
 0x1f6   : > { %v550_v41 = vpop.xlane.xlu0 %549 }
 0x1f7   : > { %v552_v42 = vmax.f32 %v546_v39, %v550_v41  ;;  %v555_v63 = vmul.f32 1.442695, %v553_v40 }
 0x1f9   : > { %v554_v45 = vsub.f32 %v546_v39, %v552_v42  ;;  %589 = vst.msk [vmem:[#allocation3 + $0x8] sm:$0xff] %vm585_vm4, %v552_v42  ;;  %570 = vperm.xlu1 %1048, %v552_v42  }
 0x1fb   : > { %v557_v0 = vmul.f32 1.442695, %v554_v45 }
 0x1fc   : > { %v614_v17 = vld [vmem:[#allocation3] sm:$0xff] (!%p894_p6) }
 0x1fd   : > { %596 = vperm.xlu1 %1048, %v1479_v46  }
 0x1fe   : > { %v594_v48 = vpop.permute.xlu0 %593 }
 0x1ff   : > { %vm598_vm5 = vcmp.eq.s32.totalorder %v544_v47, %v594_v48 }
 0x200   : > { %v600_v49 = vsel %vm598_vm5, %v521_v29, 0.0  ;;  %v615_v20 = vld [vmem:[#allocation3 + $0x8] sm:$0xff] (!%p894_p6) }
 0x201   : > { %602 = vadd.xlane.f32.xlu0 %v600_v49 }
 0x274   : > { %v566_v50 = vpop.permute.xlu1 %565 }
 0x275   : > { %v573_v51 = vsub.f32 %v521_v29, %v566_v50 }
 0x277   : > { %v575_v52 = vmul.f32 1.442695, %v573_v51 }
 0x278   : > { %v571_v53 = vpop.permute.xlu1 %570 }
 0x279   : > { %1052 = vpow2.f32 %v575_v52  ;;  %v574_v54 = vsub.f32 %v524_v31, %v571_v53 }
 0x27b   : > { %v577_v55 = vmul.f32 1.442695, %v574_v54 }
 0x27c   : > { %v597_v57 = vpop.permute.xlu1 %596 }
 0x27d   : > { %1054 = vpow2.f32 %v577_v55  ;;  %vm599_vm6 = vcmp.eq.s32.totalorder %v544_v47, %v597_v57 }
 0x27e   : > { %v601_v59 = vsel %vm599_vm6, %v524_v31, 0.0  ;;  %1056 = vpow2.f32 %v555_v63 }
 0x27f   : > { %1058 = vpow2.f32 %v557_v0 }
 0x283   : > { %v1053_v56 = vpop.eup %1052 }
 0x284   : > { %579 = vadd.xlane.f32.xlu1 %v1053_v56 }
 0x287   : > { %v1055_v58 = vpop.eup %1054 }
 0x288   : > { %581 = vadd.xlane.f32.xlu1 %v1055_v58  ;;  %v1057_v1 = vpop.eup %1056 }
 0x289   : > { %v561_v3 = vmul.f32 %v1057_v1, %v559_v2  ;;  %v1059_v4 = vpop.eup %1058 }
 0x28a   : > { %v562_v8 = vmul.f32 %v1059_v4, %v560_v6 }
 0x28c   : > { %604 = vadd.xlane.f32.xlu1 %v601_v59 }
 0x28e   : > { %v603_v61 = vpop.xlane.xlu0 %602 }
 0x28f   : > { %v606_v62 = vadd.f32 %v603_v61, %v590_v60 }
 0x291   : > { %608 = vst.msk [vmem:[#allocation5] sm:$0xff] %vm585_vm4, %v606_v62 }
 0x298   : > { %v626_v21 = vld [vmem:[#allocation5] sm:$0xff] (!%p894_p6) }
 0x311   : > { %v580_v5 = vpop.xlane.xlu1 %579 }
 0x312   : > { %v583_v7 = vadd.f32 %v580_v5, %v561_v3 }
 0x314   : > { %586 = vst.msk [vmem:[#allocation4] sm:$0xff] %vm585_vm4, %v583_v7 }
 0x315   : > { %v582_v9 = vpop.xlane.xlu1 %581 }
 0x316   : > { %v584_v10 = vadd.f32 %v582_v9, %v562_v8  ;;  %613 = sbr.rel (%p894_p6) target bundleno = 819 (0x333), region = 81 }
 0x318   : > { %587 = vst.msk [vmem:[#allocation4 + $0x8] sm:$0xff] %vm585_vm4, %v584_v10 }
 0x319   : > { %v605_v12 = vpop.xlane.xlu1 %604 }
 0x31a   : > { %v607_v13 = vadd.f32 %v605_v12, %v591_v11 }
 0x31b   : > { %v616_v14 = vld [vmem:[#allocation4] sm:$0xff] (!%p894_p6) }
 0x31c   : > { %609 = vst.msk [vmem:[#allocation5 + $0x8] sm:$0xff] %vm585_vm4, %v607_v13  ;;  %1060 = vlog2.f32 (!%p894_p6), %v616_v14 }
 0x31f   : > { %v617_v15 = vld [vmem:[#allocation4 + $0x8] sm:$0xff] }
 0x320   : > { %1062 = vlog2.f32 %v617_v15 }
 0x323   : > { %v627_v24 = vld [vmem:[#allocation5 + $0x8] sm:$0xff] }
 0x326   : > { %v1061_v16 = vpop.eup %1060 }
 0x327   : > { %v619_v19 = vmul.f32 0.6931472, %v1061_v16 }
 0x329   : > { %v622_v23 = vadd.f32 %v619_v19, %v614_v17 }
 0x32a   : > { %v1063_v18 = vpop.eup %1062 }
 0x32b   : > { %v621_v22 = vmul.f32 0.6931472, %v1063_v18  ;;  %v628_v26 = vsub.f32 %v622_v23, %v626_v21 }
 0x32d   : > { %v623_v25 = vadd.f32 %v621_v22, %v615_v20  ;;  %v630_v28 = vsel %vm624_vm7, %v628_v26, 0.0 }
 0x32e   : > { %632 = vst.msk [vmem:[%s1350_s25] sm:$0xff] %vm585_vm4, %v630_v28 }
 0x32f   : > { %v629_v27 = vsub.f32 %v623_v25, %v627_v24 }
 0x331   : > { %v631_v29 = vsel %vm625_vm8, %v629_v27, 0.0 }
 0x332   : > { %633 = vst.msk [vmem:[%s1350_s25 + $0x8] sm:$0xff] %vm585_vm4, %v631_v29 }
 0x333 PF: > { %s935_s8 = sshll.u32 %s1176_s28, 2  ;;  %s1598_s16 = scalar_lea.vmem [#allocation9], %s1339_s21 }
 0x334   : > { %s652_s29 = sadd.s32 %s1172_s27, %s935_s8  ;;  %s655_s19 = sshll.u32 %s1598_s16, 4  ;;  %s1497_s19 = int_to_ptr.vmem [resolvable:$true] %s655_s19 }
 0x335   : > { %s898_s0 = sshll.u32 %s652_s29, 6  ;;  %s1599_s1 = sand.u32 1, %s1156_s24  }
 0x336   : > { %s1502_s25 = scalar_lea.hbm %s1568_s4, %s898_s0  ;;  %s1506_s10 = scalar_lea.sflag [#allocation10], %s1599_s1 }
 0x337   : > { %s1076_s13 = scalar_lea.vmem %s1497_s19, 128  ;;  %s1196_s27 = smov [#allocation9]  }
 0x338   : > { %p1077_p7 = scmp.ne.s32.totalorder %s1497_s19, %s1076_s13  ;;  %s1080_s28 = sshll.u32 %s1196_s27, 4  ;;  %s1081_s28 = int_to_ptr.vmem [resolvable:$false] %s1080_s28 }
 0x339   : > { %s1082_s21 = scalar_lea.vmem %s1081_s28, 256  ;;  %p1083_p10 = scmp.lt.s32.totalorder %s1497_s19, %s1081_s28 }
 0x33a   : > { %p1078_p8 = pnand %p1077_p7, %p1312_p1  ;;  %p1084_p11 = scmp.lt.s32.totalorder %s1082_s21, %s1076_s13 }
 0x33c   : > { %p1079_p9 = pneg %p1078_p8  ;;  %p1085_p12 = por %p1084_p11, %p1083_p10 }
 0x33e   : > { %p1086_p13 = pnand %p1085_p12, %p1079_p9 }
 0x340   : > { %1089 = shalt.err (!%p1086_p13)
}
 0x341   : > { %s1090_s11 = scalar_lea.hbm %s1502_s25, 128  ;;  %s1094_s5 = scalar_lea.hbm %s1568_s4, 512 }
 0x342   : > { %p1091_p0 = scmp.ne.s32.totalorder %s1502_s25, %s1090_s11  ;;  %p1095_p5 = scmp.lt.u32.totalorder %s1502_s25, %s1568_s4 }
 0x343   : > { %p1096_p6 = scmp.lt.u32.totalorder %s1094_s5, %s1090_s11  ;;  %p1098_p8 = scmp.lt.u32.totalorder %s1090_s11, %s1502_s25 }
 0x344   : > { %p1092_p2 = pnand %p1091_p0, %p1312_p1 }
 0x345   : > { %p1097_p7 = por %p1096_p6, %p1095_p5 }
 0x346   : > { %p1093_p4 = pneg %p1092_p2 }
 0x347   : > { %p1099_p9 = por %p1098_p8, %p1097_p7 }
 0x349   : > { %p1100_p10 = pnand %p1099_p9, %p1093_p4 }
 0x34b   : > { %1103 = shalt.err (!%p1100_p10)
}
 0x34c   : > { %s1197_s15 = smov 64   ;;  %s1198_s30 = smov 128  }
 0x34d   : > { %s1199_s17 = smov 4  }
 0x34e   : > { %952 = dma.vmem_to_hbm [thread:$0]  (%p1312_p1), %s1497_s19, 128, %s1502_s25, %s1506_s10, %s1197_s15, %s1198_s30, %s1199_s17  }
 0x34f PF: > { %p958_p11 = scmp.ge.s32.totalorder %s1188_s6, 2  ;;  %s674_s14 = sand.u32 1, %s1152_s23  }
 0x350   : > { %s675_s8 = scalar_lea.sflag [#allocation10], %s674_s14 }
 0x351   : > { %p955_p12 = pnand %p958_p11, %p1319_p3 }
 0x353   : > { %1147 = dma.done.wait (!%p955_p12), %s675_s8, 128  }
 0x354   : > { %1149 = vsyncadd (!%p955_p12), %s675_s8, 4294967168  ;;  %s25_s6 = sadd.s32 1, %s1188_s6   ;;  %s1600_s29 = sld [smem:[#allocation13_spill]] }
 0x355   : > { %p22_p13 = scmp.ge.s32.totalorder %s25_s6, 6   ;;  %s1601_s0 = sld [smem:[#allocation20_spill]] }
 0x356   : > { %s1602_s25 = sld [smem:[#allocation14_spill]]  ;;  %s1603_s26 = sld [smem:[#allocation19_spill]] }
 0x357   : > { %s1604_s27 = sld [smem:[#allocation15_spill]]  ;;  %s1605_s28 = sld [smem:[#allocation16_spill]] }
 0x358   : > { %s1606_s18 = sld [smem:[#allocation17_spill]]  ;;  %s1607_s30 = sld [smem:[#allocation18_spill]] }
 0x359   : > { %s1608_s23 = smov %s1156_s24  ;;  %24 = sbr.rel (!%p22_p13) target bundleno = 22 (0x16), region = 152 }
 0x35a   : > { %s1609_s24 = smov %s1600_s29 }
 0x35e   : > { %s1610_s29 = smov %s1606_s18 }
 0x360   :  { %688 = vsyncpa [#allocation10], 1 }
 0x361   :  { %690 = vsyncpa [#allocation10 + $0x1], 1 }

</bundles_post_ra>
